<compile_context>
chip_gen: v5e
topology: v5e:2x2
jax: 0.10.0
libtpu: 0.0.40
codegen_flags: <defaults>
</compile_context>

<pallas_src>
import math

import jax
import jax.numpy as jnp
import numpy as np
from jax.experimental import pallas as pl
from jax.experimental.pallas import tpu as pltpu


# ---------------------------------------------------------------------------
# generation-aware VMEM planning
# ---------------------------------------------------------------------------
def _vmem_plan():
    """Returns (vmem_limit_bytes, pass1_tile_budget, pass2_tile_budget)."""
    cap = 128 * 1024 * 1024
    try:
        info_cap = int(pltpu.get_tpu_info().vmem_capacity_bytes)
        if info_cap > 0:
            cap = info_cap
    except Exception:
        pass
    if cap <= 64 * 1024 * 1024:
        limit = 44 * 1024 * 1024        # v7x-class: 64 MiB physical per core
    else:
        limit = 64 * 1024 * 1024        # v5e / v6e: 128 MiB physical
    # pass 1 holds extra f32 temporaries (x*x, per-block folds) -> smaller budget;
    # pass 2 is x-in + y-out (double-buffered) + one f32 temp.
    return limit, limit // 8, limit // 6


# ---------------------------------------------------------------------------
# pass 1: streamed per-channel sum / sum-of-squares (MXU ones-matmul reduce)
# ---------------------------------------------------------------------------
def _stats_kernel(x_ref, ones_ref, sum_ref, sumsq_ref):
    @pl.when((pl.program_id(1) == 0) & (pl.program_id(2) == 0))
    def _init():
        sum_ref[...] = jnp.zeros_like(sum_ref)
        sumsq_ref[...] = jnp.zeros_like(sumsq_ref)

    x = x_ref[...].astype(jnp.float32)              # (bb, C, hwt)
    xb = jnp.sum(x, axis=0)                         # (C, hwt)   VPU adds (leading dim)
    xxb = jnp.sum(x * x, axis=0)                    # (C, hwt)   VPU mul + adds
    ones = ones_ref[...]                            # (hwt, 8)
    # HW reduction on the MXU; HIGHEST keeps the f32 contraction exact.
    ps = jnp.dot(xb, ones, preferred_element_type=jnp.float32,
                 precision=jax.lax.Precision.HIGHEST)          # (C, 8)
    pss = jnp.dot(xxb, ones, preferred_element_type=jnp.float32,
                  precision=jax.lax.Precision.HIGHEST)         # (C, 8)
    sum_ref[...] += ps[None]
    sumsq_ref[...] += pss[None]


# ---------------------------------------------------------------------------
# pass 2: lane-dense elementwise  y = x * scale + shift
# (scale / shift are (1, L) rows tiling the period-W broadcast pattern; they
#  sublane-broadcast over the row tile)
# ---------------------------------------------------------------------------
def _affine_kernel(x_ref, scale_ref, shift_ref, y_ref):
    x = x_ref[...].astype(jnp.float32)              # (tm, L)
    y_ref[...] = (x * scale_ref[...] + shift_ref[...]).astype(y_ref.dtype)


# ---------------------------------------------------------------------------
# tile-size helpers (bound block bytes for arbitrary NCHW shapes)
# ---------------------------------------------------------------------------
def _pick_hw_tile(hw, c, ebytes, budget):
    """Largest multiple of 128 dividing HW with one (1, C, hwt) slab <= budget."""
    if hw % 128 != 0:
        # TODO(synk): odd HW (e.g. 7x7 maps) cannot be lane-tiled; use full HW.
        return hw
    m = hw // 128
    kmax = max(1, min(m, 256, budget // max(128 * c * ebytes, 1)))
    k = kmax
    while m % k != 0:
        k -= 1
    return 128 * k


def _pick_batch_tile(b, c, hwt, ebytes, budget):
    """Largest divisor of B keeping a (bb, C, hwt) block <= budget."""
    per = max(c * hwt * ebytes, 1)
    bb = max(1, min(b, budget // per))
    while b % bb != 0:
        bb -= 1
    return bb


def _pick_lane_width(total, w):
    """Pass-2 lane width: a multiple of W (broadcast period) that is also a
    multiple of 128 when divisibility allows -> unmasked, lane-dense stores."""
    base = w * (128 // math.gcd(w, 128))            # lcm(W, 128)
    if total % base != 0:
        base = w                                    # fallback: masked stores
    lane = base
    while lane * 2 <= 2048 and total % (lane * 2) == 0:
        lane *= 2
    return lane


def _pick_row_tile(rows, lane, ebytes, budget):
    """Rows per affine block: multiple of 8 under budget; cdiv grid handles a
    partial last block, so it need not divide `rows`."""
    tm = max(8, (budget // max(lane * ebytes, 1)) // 8 * 8)
    return rows if tm >= rows else tm


# ---------------------------------------------------------------------------
# forward
# ---------------------------------------------------------------------------
def batchnorm2d_forward(x, weight, bias, running_mean, running_var,
                        *, eps=1e-5, momentum=0.1):
    """Returns (y, new_running_mean, new_running_var).  x is NCHW."""
    B, C, H, W = x.shape
    assert C == W, ("the reference forward broadcasts the (C,) stats over the "
                    "last axis W (trailing-dim broadcasting), so it needs C == W")
    HW = H * W
    total = B * C * H * W
    n = B * H * W
    ebytes = jnp.dtype(x.dtype).itemsize

    vmem_limit, budget1, budget2 = _vmem_plan()

    # ---- pass 1: per-channel sum / sum-of-squares -------------------------
    x3 = x.reshape(B, C, HW)                        # free view of contiguous NCHW
    hwt = _pick_hw_tile(HW, C, ebytes, budget1)
    bb = _pick_batch_tile(B, C, hwt, ebytes, budget1)
    nb, nhw = B // bb, HW // hwt

    # Optional 2-way split of the reduction so v7x's two TensorCores can both
    # stream pass 1 (leading 'parallel' axis, per-core partial sums).
    P, nb_in, nhw_in, split_b = 1, nb, nhw, False
    if nb % 2 == 0 and nb >= 2:
        P, nb_in, split_b = 2, nb // 2, True
    elif nhw % 2 == 0 and nhw >= 2:
        P, nhw_in = 2, nhw // 2

    if split_b:
        x_idx = lambda p, i, j, nbi=nb_in: (p * nbi + i, 0, j)
    else:
        x_idx = lambda p, i, j, nhj=nhw_in: (i, 0, p * nhj + j)

    ones = jnp.ones((hwt, 8), jnp.float32)          # MXU reduction vector (N=8)

    psum, psumsq = pl.pallas_call(
        _stats_kernel,
        out_shape=(jax.ShapeDtypeStruct((P, C, 8), jnp.float32),
                   jax.ShapeDtypeStruct((P, C, 8), jnp.float32)),
        grid_spec=pltpu.PrefetchScalarGridSpec(
            num_scalar_prefetch=0,
            grid=(P, nb_in, nhw_in),
            in_specs=[pl.BlockSpec((bb, C, hwt), x_idx),
                      pl.BlockSpec((hwt, 8), lambda p, i, j: (0, 0))],
            out_specs=[pl.BlockSpec((1, C, 8), lambda p, i, j: (p, 0, 0)),
                       pl.BlockSpec((1, C, 8), lambda p, i, j: (p, 0, 0))],
        ),
        compiler_params=pltpu.CompilerParams(
            dimension_semantics=("parallel", "arbitrary", "arbitrary"),
            vmem_limit_bytes=vmem_limit),
    )(x3, ones)

    # Tiny (P, C)-sized finalization stays in the wrapper (negligible work).
    sum_x = jnp.sum(psum[:, :, 0], axis=0)                     # (C,)
    sum_xx = jnp.sum(psumsq[:, :, 0], axis=0)                  # (C,)
    nf = float(n)
    mean = sum_x / nf                                          # (C,)
    # TODO(synk): E[x^2]-E[x]^2 in f32 cancels for |mean| >> std; a shifted /
    # two-pass variance would cost one extra read of x if that matters.
    var = jnp.maximum(sum_xx - nf * mean * mean, 0.0) / (nf - 1.0)   # unbiased (ddof=1)
    inv_std = jax.lax.rsqrt(var + eps)
    scale = inv_std * weight.astype(jnp.float32)               # (C,) == (W,)
    shift = bias.astype(jnp.float32) - mean * scale            # (C,) == (W,)

    # ---- pass 2: lane-dense elementwise normalize + affine ----------------
    L = _pick_lane_width(total, W)
    R = total // L
    x2 = x.reshape(R, L)                                       # free view
    scale_row = jnp.tile(scale, (L // W,)).reshape(1, L)       # period-W pattern
    shift_row = jnp.tile(shift, (L // W,)).reshape(1, L)

    tm = _pick_row_tile(R, L, ebytes, budget2)
    y2 = pl.pallas_call(
        _affine_kernel,
        out_shape=jax.ShapeDtypeStruct((R, L), x.dtype),
        grid_spec=pltpu.PrefetchScalarGridSpec(
            num_scalar_prefetch=0,
            grid=(pl.cdiv(R, tm),),
            in_specs=[pl.BlockSpec((tm, L), lambda i: (i, 0)),
                      pl.BlockSpec((1, L), lambda i: (0, 0)),
                      pl.BlockSpec((1, L), lambda i: (0, 0))],
            out_specs=pl.BlockSpec((tm, L), lambda i: (i, 0)),
        ),
        compiler_params=pltpu.CompilerParams(
            dimension_semantics=("parallel",),
            vmem_limit_bytes=vmem_limit),
    )(x2, scale_row, shift_row)

    y = y2.reshape(B, C, H, W)

    # Running-stat buffer update (module state) handled functionally here.
    new_running_mean = momentum * mean + (1.0 - momentum) * running_mean
    new_running_var = momentum * var + (1.0 - momentum) * running_var
    return y, new_running_mean, new_running_var


def _reference_forward(x, weight, bias, eps):
    """Pure-jnp transcription of the PyTorch forward (for self-check)."""
    x_mean = jnp.mean(x, axis=(0, 2, 3))                 # (C,)
    x_var = jnp.var(x, axis=(0, 2, 3), ddof=1)           # torch.var default (unbiased)
    x_scaled = (x - x_mean) / jnp.sqrt(x_var + eps)      # broadcasts over W
    return x_scaled * weight + bias


if __name__ == "__main__":
    B, C, H, W = 2, 16, 8, 16   # C == W required by the reference's broadcast
    eps, momentum = 1e-5, 0.1

    key = jax.random.PRNGKey(0)
    kx, kw, kb = jax.random.split(key, 3)
    x = jax.random.normal(kx, (B, C, H, W), dtype=jnp.float32)

    # deterministic parameter init mirroring __init__: (rand*2-1)/sqrt(C)
    weight = (jax.random.uniform(kw, (C,)) * 2.0 - 1.0) / np.sqrt(C)
    bias = (jax.random.uniform(kb, (C,)) * 2.0 - 1.0) / np.sqrt(C)
    running_mean = jnp.zeros((C,), jnp.float32)
    running_var = jnp.zeros((C,), jnp.float32)

    y, new_rm, new_rv = batchnorm2d_forward(
        x, weight, bias, running_mean, running_var, eps=eps, momentum=momentum)
    jax.block_until_ready((y, new_rm, new_rv))

    y_ref = _reference_forward(x, weight, bias, eps)
    rm_ref = momentum * jnp.mean(x, axis=(0, 2, 3)) + (1 - momentum) * running_mean
    rv_ref = momentum * jnp.var(x, axis=(0, 2, 3), ddof=1) + (1 - momentum) * running_var

    assert y.shape == (B, C, H, W) and y.dtype == x.dtype
    np.testing.assert_allclose(np.asarray(y), np.asarray(y_ref), rtol=1e-4, atol=1e-5)
    np.testing.assert_allclose(np.asarray(new_rm), np.asarray(rm_ref), rtol=1e-4, atol=1e-5)
    np.testing.assert_allclose(np.asarray(new_rv), np.asarray(rv_ref), rtol=1e-4, atol=1e-5)

    print("KERNEL_OK")
</pallas_src>

<mosaic_0001>
module attributes {stable_mosaic.version = 11 : i64} {
  func.func @_stats_kernel(%arg0: i32, %arg1: i32, %arg2: i32, %arg3: memref<2x16x128xf32, #tpu.memory_space<vmem>>, %arg4: memref<128x8xf32, #tpu.memory_space<vmem>>, %arg5: memref<1x16x8xf32, #tpu.memory_space<vmem>>, %arg6: memref<1x16x8xf32, #tpu.memory_space<vmem>>) attributes {dimension_semantics = [#tpu.dimension_semantics<parallel>, #tpu.dimension_semantics<arbitrary>, #tpu.dimension_semantics<arbitrary>], iteration_bounds = array<i64: 1, 1, 1>, scalar_prefetch = 0 : i64, scratch_operands = 0 : i64, tpu.core_type = #tpu.core_type<tc>, window_params = [{transform_indices = @transform_0, window_bounds = array<i64: 2, 16, 128>}, {pipeline_mode = #tpu.pipeline_mode<synchronous>, transform_indices = @transform_1, window_bounds = array<i64: 128, 8>}, {transform_indices = @transform_2, window_bounds = array<i64: 1, 16, 8>}, {transform_indices = @transform_3, window_bounds = array<i64: 1, 16, 8>}]} {
    %c0_i32 = arith.constant 0 : i32
    %0 = arith.cmpi eq, %arg1, %c0_i32 : i32
    %c0_i32_0 = arith.constant 0 : i32
    %1 = arith.cmpi eq, %arg2, %c0_i32_0 : i32
    %2 = arith.andi %0, %1 : i1
    %3 = arith.extui %2 : i1 to i32
    %c0_i32_1 = arith.constant 0 : i32
    %4 = arith.cmpi ne, %3, %c0_i32_1 : i32
    scf.if %4 {
      %cst_21 = arith.constant 0.000000e+00 : f32
      %20 = vector.broadcast %cst_21 : f32 to vector<1x16x8xf32>
      %c0_22 = arith.constant 0 : index
      %c0_23 = arith.constant 0 : index
      %c0_24 = arith.constant 0 : index
      %21 = vector.load %arg5[%c0_22, %c0_23, %c0_24] : memref<1x16x8xf32, #tpu.memory_space<vmem>>, vector<1x16x8xf32>
      tpu.vector_store %arg5[%c0_22, %c0_23, %c0_24], %20 {strides = array<i32>} : memref<1x16x8xf32, #tpu.memory_space<vmem>>, vector<1x16x8xf32>,
      %cst_25 = arith.constant 0.000000e+00 : f32
      %22 = vector.broadcast %cst_25 : f32 to vector<1x16x8xf32>
      %c0_26 = arith.constant 0 : index
      %c0_27 = arith.constant 0 : index
      %c0_28 = arith.constant 0 : index
      %23 = vector.load %arg6[%c0_26, %c0_27, %c0_28] : memref<1x16x8xf32, #tpu.memory_space<vmem>>, vector<1x16x8xf32>
      tpu.vector_store %arg6[%c0_26, %c0_27, %c0_28], %22 {strides = array<i32>} : memref<1x16x8xf32, #tpu.memory_space<vmem>>, vector<1x16x8xf32>,
    } else {
    }
    %c0 = arith.constant 0 : index
    %c0_2 = arith.constant 0 : index
    %c0_3 = arith.constant 0 : index
    %5 = vector.load %arg3[%c0, %c0_2, %c0_3] : memref<2x16x128xf32, #tpu.memory_space<vmem>>, vector<2x16x128xf32>
    %cst = arith.constant dense<0.000000e+00> : vector<16x128xf32>
    %6 = vector.multi_reduction <add>, %5, %cst [0] : vector<2x16x128xf32> to vector<16x128xf32>
    %7 = arith.mulf %5, %5 : vector<2x16x128xf32>
    %cst_4 = arith.constant dense<0.000000e+00> : vector<16x128xf32>
    %8 = vector.multi_reduction <add>, %7, %cst_4 [0] : vector<2x16x128xf32> to vector<16x128xf32>
    %c0_5 = arith.constant 0 : index
    %c0_6 = arith.constant 0 : index
    %9 = vector.load %arg4[%c0_5, %c0_6] : memref<128x8xf32, #tpu.memory_space<vmem>>, vector<128x8xf32>
    %cst_7 = arith.constant dense<0.000000e+00> : vector<16x8xf32>
    %10 = tpu.matmul %6, %9, %cst_7 {dimension_numbers = #tpu.dot_dimension_numbers<[1], [0], [0], [1], [0, 0, 1, 1], [], []>, precision = #tpu.contract_precision<fp32>} : vector<16x128xf32>, vector<128x8xf32>, vector<16x8xf32> -> vector<16x8xf32>
    %cst_8 = arith.constant dense<0.000000e+00> : vector<16x8xf32>
    %11 = tpu.matmul %8, %9, %cst_8 {dimension_numbers = #tpu.dot_dimension_numbers<[1], [0], [0], [1], [0, 0, 1, 1], [], []>, precision = #tpu.contract_precision<fp32>} : vector<16x128xf32>, vector<128x8xf32>, vector<16x8xf32> -> vector<16x8xf32>
    %c0_9 = arith.constant 0 : index
    %c0_10 = arith.constant 0 : index
    %c0_11 = arith.constant 0 : index
    %12 = vector.load %arg5[%c0_9, %c0_10, %c0_11] : memref<1x16x8xf32, #tpu.memory_space<vmem>>, vector<1x16x8xf32>
    %13 = vector.shape_cast %10 : vector<16x8xf32> to vector<1x16x8xf32>
    %14 = arith.addf %12, %13 : vector<1x16x8xf32>
    %c0_12 = arith.constant 0 : index
    %c0_13 = arith.constant 0 : index
    %c0_14 = arith.constant 0 : index
    %15 = vector.load %arg5[%c0_12, %c0_13, %c0_14] : memref<1x16x8xf32, #tpu.memory_space<vmem>>, vector<1x16x8xf32>
    tpu.vector_store %arg5[%c0_12, %c0_13, %c0_14], %14 {strides = array<i32>} : memref<1x16x8xf32, #tpu.memory_space<vmem>>, vector<1x16x8xf32>,
    %c0_15 = arith.constant 0 : index
    %c0_16 = arith.constant 0 : index
    %c0_17 = arith.constant 0 : index
    %16 = vector.load %arg6[%c0_15, %c0_16, %c0_17] : memref<1x16x8xf32, #tpu.memory_space<vmem>>, vector<1x16x8xf32>
    %17 = vector.shape_cast %11 : vector<16x8xf32> to vector<1x16x8xf32>
    %18 = arith.addf %16, %17 : vector<1x16x8xf32>
    %c0_18 = arith.constant 0 : index
    %c0_19 = arith.constant 0 : index
    %c0_20 = arith.constant 0 : index
    %19 = vector.load %arg6[%c0_18, %c0_19, %c0_20] : memref<1x16x8xf32, #tpu.memory_space<vmem>>, vector<1x16x8xf32>
    tpu.vector_store %arg6[%c0_18, %c0_19, %c0_20], %18 {strides = array<i32>} : memref<1x16x8xf32, #tpu.memory_space<vmem>>, vector<1x16x8xf32>,
    return
  }
  func.func @transform_0(%arg0: i32, %arg1: i32, %arg2: i32) -> (i32, i32, i32) {
    %c1_i32 = arith.constant 1 : i32
    %0 = arith.muli %arg0, %c1_i32 : i32
    %1 = arith.addi %0, %arg2 : i32
    %c0_i32 = arith.constant 0 : i32
    %c0_i32_0 = arith.constant 0 : i32
    return %arg1, %c0_i32, %1 : i32, i32, i32
  }
  func.func @transform_1(%arg0: i32, %arg1: i32, %arg2: i32) -> (i32, i32) {
    %c0_i32 = arith.constant 0 : i32
    %c0_i32_0 = arith.constant 0 : i32
    %c0_i32_1 = arith.constant 0 : i32
    return %c0_i32, %c0_i32_0 : i32, i32
  }
  func.func @transform_2(%arg0: i32, %arg1: i32, %arg2: i32) -> (i32, i32, i32) {
    %c0_i32 = arith.constant 0 : i32
    %c0_i32_0 = arith.constant 0 : i32
    %c0_i32_1 = arith.constant 0 : i32
    return %arg0, %c0_i32, %c0_i32_0 : i32, i32, i32
  }
  func.func @transform_3(%arg0: i32, %arg1: i32, %arg2: i32) -> (i32, i32, i32) {
    %c0_i32 = arith.constant 0 : i32
    %c0_i32_0 = arith.constant 0 : i32
    %c0_i32_1 = arith.constant 0 : i32
    return %arg0, %c0_i32, %c0_i32_0 : i32, i32, i32
  }
}

</mosaic_0001>

<bundles_post_ra>
// kernel: tpu_custom_call.1
= control target key start
LH: loop header
LB: loop body
LE: loop exit
PB: predicated region body
PF: predicated region fallthrough
CT: control target
= control target key end

     0   :  { %vm36_vm0 = vcmask 64512   ;;  %s1413_s1 = inlined_call_operand.vmem [shape: f32[128,8], index: 1, kind: input, shape index: {}]   ;;  %s1414_s0 = inlined_call_operand.vmem [shape: f32[2,16,128], index: 0, kind: input, shape index: {}]   ;;  %s1415_s2 = inlined_call_operand.vmem [shape: f32[1,16,8], index: 2, kind: output, shape index: {0}]   ;;  %s1416_s3 = inlined_call_operand.vmem [shape: f32[1,16,8], index: 3, kind: output, shape index: {1}]  }
   0x1   :  { %v68_v0 = vld [vmem:[%s1413_s1 + $0x78] sm:$0xff]  ;;  %v67_v1 = vld [vmem:[%s1413_s1 + $0x70] sm:$0xff]  ;;  %v66_v2 = vld [vmem:[%s1413_s1 + $0x68] sm:$0xff] }
   0x2   :  { %v871_v3 = vand.u32 4294901760, %v68_v0  ;;  %v873_v4 = vand.u32 4294901760, %v67_v1  ;;  %v875_v5 = vand.u32 4294901760, %v66_v2  ;;  %v65_v6 = vld [vmem:[%s1413_s1 + $0x60] sm:$0xff]  ;;  %v64_v7 = vld [vmem:[%s1413_s1 + $0x58] sm:$0xff]  ;;  %v63_v8 = vld [vmem:[%s1413_s1 + $0x50] sm:$0xff] }
   0x3   :  { %v886_v9 = vand.u32 4294901760, %v65_v6  ;;  %v888_v10 = vand.u32 4294901760, %v64_v7  ;;  %v890_v11 = vand.u32 4294901760, %v63_v8  ;;  %v62_v12 = vld [vmem:[%s1413_s1 + $0x48] sm:$0xff]  ;;  %v61_v13 = vld [vmem:[%s1413_s1 + $0x40] sm:$0xff]  ;;  %v60_v18 = vld [vmem:[%s1413_s1 + $0x38] sm:$0xff] }
   0x4   :  { %70 = vmatpush.msra.mxu0 %v871_v3  ;;  %v900_v14 = vsub.f32 %v68_v0, %v871_v3  ;;  %v903_v15 = vsub.f32 %v67_v1, %v873_v4  ;;  %283 = vmatpush.msra.mxu3 %v871_v3  ;;  %v907_v16 = vsub.f32 %v66_v2, %v875_v5  ;;  %v909_v17 = vand.u32 4294901760, %v62_v12  ;;  %v59_v26 = vld [vmem:[%s1413_s1 + $0x30] sm:$0xff]  ;;  %v58_v36 = vld [vmem:[%s1413_s1 + $0x28] sm:$0xff]  ;;  %v57_v42 = vld [vmem:[%s1413_s1 + $0x20] sm:$0xff] }
   0x5   :  { %v915_v19 = vsub.f32 %v65_v6, %v886_v9  ;;  %v918_v20 = vsub.f32 %v64_v7, %v888_v10  ;;  %v920_v21 = vand.u32 4294901760, %v61_v13  ;;  %v934_v25 = vsub.f32 %v63_v8, %v890_v11  ;;  %v56_v48 = vld [vmem:[%s1413_s1 + $0x18] sm:$0xff]  ;;  %v55_v54 = vld [vmem:[%s1413_s1 + $0x10] sm:$0xff]  ;;  %v54_v60 = vld [vmem:[%s1413_s1 + $0x8] sm:$0xff] }
   0x6   :  { %72 = vmatpush.msra.mxu0 %v873_v4  ;;  %225 = vmatpush.msra.mxu2 %v900_v14  ;;  %v925_v22 = vand.u32 4294901760, %v900_v14  ;;  %v928_v23 = vand.u32 4294901760, %v903_v15  ;;  %v931_v24 = vand.u32 4294901760, %v907_v16  ;;  %v943_v28 = vand.u32 4294901760, %v60_v18  ;;  %v53_v2 = vld [vmem:[%s1413_s1] sm:$0xff] }
   0x7   :  { %285 = vmatpush.msra.mxu3 %v873_v4  ;;  %v941_v27 = vand.u32 4294901760, %v915_v19  ;;  %v946_v29 = vsub.f32 %v62_v12, %v909_v17  ;;  %v957_v33 = vand.u32 4294901760, %v918_v20  ;;  %v960_v34 = vand.u32 4294901760, %v59_v26 }
   0x8   :  { %74 = vmatpush.msra.mxu0 %v875_v5  ;;  %228 = vmatpush.msra.mxu2 %v903_v15  ;;  %v121_v30 = vsub.f32 %v900_v14, %v925_v22  ;;  %v127_v31 = vsub.f32 %v903_v15, %v928_v23  ;;  %v133_v32 = vsub.f32 %v907_v16, %v931_v24  ;;  %v977_v40 = vand.u32 4294901760, %v934_v25 }
   0x9   :  { %287 = vmatpush.msra.mxu3 %v875_v5  ;;  %v963_v35 = vsub.f32 %v61_v13, %v920_v21  ;;  %v139_v39 = vsub.f32 %v915_v19, %v941_v27  ;;  %v981_v41 = vand.u32 4294901760, %v946_v29  ;;  %v145_v44 = vsub.f32 %v918_v20, %v957_v33 }
   0xa   :  { %76 = vmatpush.msra.mxu0 %v886_v9  ;;  %v969_v37 = vand.u32 4294901760, %v121_v30  ;;  %231 = vmatpush.msra.mxu2 %v907_v16  ;;  %v972_v38 = vand.u32 4294901760, %v127_v31  ;;  %v988_v43 = vand.u32 4294901760, %v133_v32  ;;  %v992_v45 = vand.u32 4294901760, %v58_v36 }
   0xb   :  { %289 = vmatpush.msra.mxu3 %v886_v9  ;;  %v995_v46 = vsub.f32 %v60_v18, %v943_v28  ;;  %v1000_v47 = vand.u32 4294901760, %v963_v35  ;;  %v1007_v49 = vand.u32 4294901760, %v139_v39  ;;  %v151_v50 = vsub.f32 %v934_v25, %v977_v40 }
   0xc   :  { %78 = vmatpush.msra.mxu0 %v888_v10  ;;  %123 = vmatpush.msra.mxu1 %v969_v37  ;;  %v1011_v51 = vand.u32 4294901760, %v57_v42  ;;  %v1014_v52 = vsub.f32 %v59_v26, %v960_v34  ;;  %v157_v53 = vsub.f32 %v946_v29, %v981_v41  ;;  %v1025_v55 = vand.u32 4294901760, %v145_v44 }
   0xd   :  { %234 = vmatpush.msra.mxu2 %v915_v19  ;;  %291 = vmatpush.msra.mxu3 %v888_v10  ;;  %v1027_v56 = vand.u32 4294901760, %v56_v48  ;;  %v1030_v57 = vand.u32 4294901760, %v995_v46  ;;  %v1033_v58 = vsub.f32 %v58_v36, %v992_v45  ;;  %v163_v59 = vsub.f32 %v963_v35, %v1000_v47 }
   0xe   :  { %80 = vmatpush.msra.mxu0 %v890_v11  ;;  %129 = vmatpush.msra.mxu1 %v972_v38  ;;  %1423 = vst [vmem:[#allocation2_spill] sm:$0xff] %v1014_v52  ;;  %v1044_v61 = vand.u32 4294901760, %v151_v50  ;;  %v1046_v62 = vand.u32 4294901760, %v55_v54  ;;  %v1049_v63 = vand.u32 4294901760, %v1014_v52  ;;  %v1052_v0 = vsub.f32 %v57_v42, %v1011_v51 }
   0xf   :  { %237 = vmatpush.msra.mxu2 %v918_v20  ;;  %293 = vmatpush.msra.mxu3 %v890_v11  ;;  %1424 = vst [vmem:[#allocation3_spill] sm:$0xff] %v1033_v58  ;;  %v1055_v1 = vand.u32 4294901760, %v157_v53  ;;  %v169_v6 = vsub.f32 %v995_v46, %v1030_v57  ;;  %v1065_v7 = vand.u32 4294901760, %v54_v60  ;;  %v1068_v8 = vand.u32 4294901760, %v1033_v58 }
  0x10   :  { %82 = vmatpush.msra.mxu0 %v909_v17  ;;  %135 = vmatpush.msra.mxu1 %v988_v43  ;;  %1425 = vst [vmem:[#allocation4_spill] sm:$0xff] %v1052_v0  ;;  %v1071_v12 = vsub.f32 %v56_v48, %v1027_v56  ;;  %v1074_v13 = vand.u32 4294901760, %v163_v59  ;;  %v175_v18 = vsub.f32 %v1014_v52, %v1049_v63  ;;  %v1081_v26 = vand.u32 4294901760, %v53_v2 }
  0x11   :  { %240 = vmatpush.msra.mxu2 %v934_v25  ;;  %295 = vmatpush.msra.mxu3 %v909_v17  ;;  %v1084_v30 = vand.u32 4294901760, %v1052_v0  ;;  %v1087_v31 = vsub.f32 %v55_v54, %v1046_v62  ;;  %v1093_v32 = vand.u32 4294901760, %v169_v6  ;;  %v181_v36 = vsub.f32 %v1033_v58, %v1068_v8 }
  0x12   :  { %84 = vmatpush.msra.mxu0 %v920_v21  ;;  %141 = vmatpush.msra.mxu1 %v1007_v49  ;;  %1426 = vst [vmem:[#allocation5_spill] sm:$0xff] %v1071_v12  ;;  %v1098_v39 = vand.u32 4294901760, %v1071_v12  ;;  %v1101_v42 = vsub.f32 %v54_v60, %v1065_v7  ;;  %v1107_v44 = vand.u32 4294901760, %v175_v18  ;;  %v1115_v53 = vsub.f32 %v53_v2, %v1081_v26 }
  0x13   :  { %243 = vmatpush.msra.mxu2 %v946_v29  ;;  %297 = vmatpush.msra.mxu3 %v920_v21  ;;  %1427 = vst [vmem:[#allocation6_spill] sm:$0xff] %v1087_v31  ;;  %v187_v48 = vsub.f32 %v1052_v0, %v1084_v30  ;;  %v1112_v50 = vand.u32 4294901760, %v1087_v31  ;;  %v1121_v54 = vand.u32 4294901760, %v181_v36 }
  0x14   :  { %86 = vmatpush.msra.mxu0 %v943_v28  ;;  %147 = vmatpush.msra.mxu1 %v1025_v55  ;;  %1428 = vst [vmem:[#allocation7_spill] sm:$0xff] %v1115_v53  ;;  %v193_v59 = vsub.f32 %v1071_v12, %v1098_v39  ;;  %v1126_v60 = vand.u32 4294901760, %v1101_v42  ;;  %v1137_v18 = vand.u32 4294901760, %v1115_v53 }
  0x15   :  { %246 = vmatpush.msra.mxu2 %v963_v35  ;;  %299 = vmatpush.msra.mxu3 %v943_v28  ;;  %v1132_v2 = vand.u32 4294901760, %v187_v48  ;;  %v199_v6 = vsub.f32 %v1087_v31, %v1112_v50 }
  0x16   :  { %88 = vmatpush.msra.mxu0 %v960_v34  ;;  %153 = vmatpush.msra.mxu1 %v1044_v61  ;;  %v1143_v36 = vand.u32 4294901760, %v193_v59  ;;  %v205_v48 = vsub.f32 %v1101_v42, %v1126_v60 }
  0x17   :  { %249 = vmatpush.msra.mxu2 %v995_v46  ;;  %301 = vmatpush.msra.mxu3 %v960_v34  ;;  %v1161_v59 = vand.u32 4294901760, %v199_v6 }
  0x18   :  { %90 = vmatpush.msra.mxu0 %v992_v45  ;;  %159 = vmatpush.msra.mxu1 %v1055_v1 }
  0x19   :  { %252 = vmatpush.msra.mxu2 %v1014_v52  ;;  %303 = vmatpush.msra.mxu3 %v992_v45 }
  0x1a   :  { %92 = vmatpush.msra.mxu0 %v1011_v51  ;;  %165 = vmatpush.msra.mxu1 %v1074_v13 }
  0x1b   :  { %255 = vmatpush.msra.mxu2 %v1033_v58  ;;  %305 = vmatpush.msra.mxu3 %v1011_v51  ;;  %v1168_v58 = vand.u32 4294901760, %v205_v48 }
  0x1c   :  { %94 = vmatpush.msra.mxu0 %v1027_v56  ;;  %171 = vmatpush.msra.mxu1 %v1093_v32 }
  0x1d   :  { %258 = vmatpush.msra.mxu2 %v1052_v0  ;;  %307 = vmatpush.msra.mxu3 %v1027_v56  ;;  %v1152_v0 = vld [vmem:[%s1414_s0] sm:$0xff] }
  0x1e   :  { %96 = vmatpush.msra.mxu0 %v1046_v62  ;;  %177 = vmatpush.msra.mxu1 %v1107_v44 }
  0x1f   :  { %261 = vmatpush.msra.mxu2 %v1071_v12  ;;  %309 = vmatpush.msra.mxu3 %v1046_v62  ;;  %v1157_v12 = vld [vmem:[%s1414_s0 + $0x10] sm:$0xff] }
  0x20   :  { %98 = vmatpush.msra.mxu0 %v1065_v7  ;;  %183 = vmatpush.msra.mxu1 %v1121_v54  ;;  %v45_v52 = vadd.f32 %v1157_v12, %v1152_v0 }
  0x21   :  { %264 = vmatpush.msra.mxu2 %v1087_v31  ;;  %311 = vmatpush.msra.mxu3 %v1065_v7  ;;  %v211_v31 = vsub.f32 %v1115_v53, %v1137_v18 }
  0x22   :  { %100 = vmatpush.msra.mxu0 %v1081_v26  ;;  %189 = vmatpush.msra.mxu1 %v1132_v2  ;;  %v1183_v48 = vand.u32 4294901760, %v45_v52 }
  0x23   :  { %267 = vmatpush.msra.mxu2 %v1101_v42  ;;  %313 = vmatpush.msra.mxu3 %v1081_v26  ;;  %v1177_v6 = vand.u32 4294901760, %v211_v31  ;;  %v1199_v31 = vld [vmem:[%s1414_s0 + $0x18] sm:$0xff] }
  0x24   :  { %330 = vmatpush.msrb.mxu0 %v925_v22  ;;  %195 = vmatpush.msra.mxu1 %v1143_v36 }
  0x25   :  { %270 = vmatpush.msra.mxu2 %v1115_v53  ;;  %495 = vmatpush.msrb.mxu3 %v969_v37  ;;  %v1194_v37 = vld [vmem:[%s1414_s0 + $0x8] sm:$0xff] }
  0x26   :  { %334 = vmatpush.msrb.mxu0 %v928_v23  ;;  %201 = vmatpush.msra.mxu1 %v1161_v59  ;;  %v46_v53 = vadd.f32 %v1199_v31, %v1194_v37 }
  0x27   :  { %442 = vmatpush.msrb.mxu2 %v871_v3  ;;  %501 = vmatpush.msrb.mxu3 %v972_v38  ;;  %v1204_v38 = vsub.f32 %v45_v52, %v1183_v48 }
  0x28   :  { %338 = vmatpush.msrb.mxu0 %v931_v24  ;;  %207 = vmatpush.msra.mxu1 %v1168_v58 }
  0x29   :  { %444 = vmatpush.msrb.mxu2 %v873_v4  ;;  %507 = vmatpush.msrb.mxu3 %v988_v43  ;;  %v103_v43 = vand.u32 4294901760, %v1204_v38 }
  0x2a   :  { %342 = vmatpush.msrb.mxu0 %v941_v27  ;;  %213 = vmatpush.msra.mxu1 %v1177_v6 }
  0x2b   :  { %446 = vmatpush.msrb.mxu2 %v875_v5  ;;  %513 = vmatpush.msrb.mxu3 %v1007_v49  ;;  %v1221_v49 = vand.u32 4294901760, %v46_v53  ;;  %v104_v52 = vsub.f32 %v1204_v38, %v103_v43 }
  0x2c   :  { %346 = vmatpush.msrb.mxu0 %v957_v33  ;;  %401 = vmatpush.msrb.mxu1 %v871_v3 }
  0x2d   :  { %448 = vmatpush.msrb.mxu2 %v886_v9  ;;  %519 = vmatpush.msrb.mxu3 %v1025_v55  ;;  %v1233_v55 = vsub.f32 %v46_v53, %v1221_v49 }
  0x2e   :  { %350 = vmatpush.msrb.mxu0 %v977_v40  ;;  %403 = vmatpush.msrb.mxu1 %v873_v4 }
  0x2f   :  { %450 = vmatpush.msrb.mxu2 %v888_v10  ;;  %525 = vmatpush.msrb.mxu3 %v1044_v61  ;;  %v105_v61 = vand.u32 4294901760, %v104_v52 }
  0x30   :  { %354 = vmatpush.msrb.mxu0 %v981_v41  ;;  %405 = vmatpush.msrb.mxu1 %v875_v5 }
  0x31   :  { %452 = vmatpush.msrb.mxu2 %v890_v11  ;;  %531 = vmatpush.msrb.mxu3 %v1055_v1  ;;  %v111_v1 = vand.u32 4294901760, %v1233_v55 }
  0x32   :  { %358 = vmatpush.msrb.mxu0 %v1000_v47  ;;  %407 = vmatpush.msrb.mxu1 %v886_v9 }
  0x33   :  { %454 = vmatpush.msrb.mxu2 %v909_v17  ;;  %537 = vmatpush.msrb.mxu3 %v1074_v13  ;;  %v112_v13 = vsub.f32 %v1233_v55, %v111_v1 }
  0x34   :  { %362 = vmatpush.msrb.mxu0 %v1030_v57  ;;  %409 = vmatpush.msrb.mxu1 %v888_v10 }
  0x35   :  { %456 = vmatpush.msrb.mxu2 %v920_v21  ;;  %543 = vmatpush.msrb.mxu3 %v1093_v32  ;;  %v47_v32 = vmul.f32 %v1152_v0, %v1152_v0  ;;  %v113_v0 = vand.u32 4294901760, %v112_v13 }
  0x36   :  { %366 = vmatpush.msrb.mxu0 %v1049_v63  ;;  %411 = vmatpush.msrb.mxu1 %v890_v11 }
  0x37   :  { %458 = vmatpush.msrb.mxu2 %v943_v28  ;;  %549 = vmatpush.msrb.mxu3 %v1107_v44  ;;  %v49_v44 = vmul.f32 %v1157_v12, %v1157_v12 }
  0x38   :  { %370 = vmatpush.msrb.mxu0 %v1068_v8  ;;  %413 = vmatpush.msrb.mxu1 %v909_v17 }
  0x39   :  { %460 = vmatpush.msrb.mxu2 %v960_v34  ;;  %106 = vmatmul.f32.vlgmr.msra.gmra.mxu0 %v105_v61  ;;  %v51_v12 = vadd.f32 %v49_v44, %v47_v32 }
  0x3a   :  { %374 = vmatpush.msrb.mxu0 %v1084_v30  ;;  %415 = vmatpush.msrb.mxu1 %v920_v21 }
  0x3b   :  { %462 = vmatpush.msrb.mxu2 %v992_v45  ;;  %555 = vmatpush.msrb.mxu3 %v1121_v54  ;;  %v1272_v53 = vand.u32 4294901760, %v51_v12 }
  0x3c   :  { %378 = vmatpush.msrb.mxu0 %v1098_v39  ;;  %417 = vmatpush.msrb.mxu1 %v943_v28 }
  0x3d   :  { %464 = vmatpush.msrb.mxu2 %v1011_v51  ;;  %215 = vmatmul.f32.vlgmr.msra.gmra.mxu1 %v1183_v48 }
  0x3e   :  { %382 = vmatpush.msrb.mxu0 %v1112_v50  ;;  %419 = vmatpush.msrb.mxu1 %v960_v34 }
  0x3f   :  { %466 = vmatpush.msrb.mxu2 %v1027_v56  ;;  %561 = vmatpush.msrb.mxu3 %v1132_v2 }
  0x40   :  { %386 = vmatpush.msrb.mxu0 %v1126_v60  ;;  %421 = vmatpush.msrb.mxu1 %v992_v45 }
  0x41   :  { %468 = vmatpush.msrb.mxu2 %v1046_v62  ;;  %567 = vmatpush.msrb.mxu3 %v1143_v36 }
  0x42   :  { %390 = vmatpush.msrb.mxu0 %v1137_v18  ;;  %423 = vmatpush.msrb.mxu1 %v1011_v51 }
  0x43   :  { %273 = vmatmul.f32.vlgmr.msra.gmra.mxu2 %v1204_v38  ;;  %573 = vmatpush.msrb.mxu3 %v1161_v59 }
  0x44   :  { %597 = vmatpush.msra.mxu0 %v900_v14  ;;  %425 = vmatpush.msrb.mxu1 %v1027_v56  ;;  %v48_v14 = vmul.f32 %v1194_v37, %v1194_v37 }
  0x45   :  { %470 = vmatpush.msrb.mxu2 %v1065_v7  ;;  %114 = vmatmul.f32.gmra.mxu0 %v113_v0 }
  0x46   :  { %600 = vmatpush.msra.mxu0 %v903_v15  ;;  %317 = vmatmul.f32.vlgmr.msra.gmra.mxu3 %v103_v43  ;;  %v50_v15 = vmul.f32 %v1199_v31, %v1199_v31 }
  0x47   :  { %427 = vmatpush.msrb.mxu1 %v1046_v62  ;;  %472 = vmatpush.msrb.mxu2 %v1081_v26 }
  0x48   :  { %579 = vmatpush.msrb.mxu3 %v1168_v58  ;;  %603 = vmatpush.msra.mxu0 %v907_v16  ;;  %v1287_v16 = vsub.f32 %v51_v12, %v1272_v53 }
  0x49   :  { %702 = vmatpush.msra.mxu2 %v925_v22  ;;  %219 = vmatmul.f32.gmra.mxu1 %v1221_v49  ;;  %v52_v22 = vadd.f32 %v50_v15, %v48_v14 }
  0x4a   :  { %429 = vmatpush.msrb.mxu1 %v1065_v7  ;;  %585 = vmatpush.msrb.mxu3 %v1177_v6 }
  0x4b   :  { %606 = vmatpush.msra.mxu0 %v915_v19  ;;  %706 = vmatpush.msra.mxu2 %v928_v23  ;;  %v475_v19 = vand.u32 4294901760, %v1287_v16  ;;  %v1429_v23 = vld [vmem:[#allocation2_spill] sm:$0xff] }
  0x4c   :  { %773 = vmatpush.msra.mxu3 %v871_v3  ;;  %431 = vmatpush.msrb.mxu1 %v1081_v26 }
  0x4d   :  { %609 = vmatpush.msra.mxu0 %v918_v20  ;;  %710 = vmatpush.msra.mxu2 %v931_v24  ;;  %v476_v20 = vsub.f32 %v1287_v16, %v475_v19 }
  0x4e   :  { %655 = vmatpush.msra.mxu1 %v871_v3  ;;  %775 = vmatpush.msra.mxu3 %v873_v4  ;;  %v1302_v3 = vand.u32 4294901760, %v52_v22 }
  0x4f   :  { %278 = vmatmul.f32.gmra.mxu2 %v1233_v55  ;;  %612 = vmatpush.msra.mxu0 %v934_v25  ;;  %v1432_v25 = vld [vmem:[#allocation5_spill] sm:$0xff] }
  0x50   :  { %657 = vmatpush.msra.mxu1 %v873_v4  ;;  %714 = vmatpush.msra.mxu2 %v941_v27  ;;  %v482_v4 = vsub.f32 %v52_v22, %v1302_v3  ;;  %v1433_v27 = vld [vmem:[#allocation6_spill] sm:$0xff] }
  0x51   :  { %777 = vmatpush.msra.mxu3 %v875_v5  ;;  %392 = vmatmul.f32.vlgmr.msrb.gmra.mxu0 %v1183_v48 }
  0x52   :  { %323 = vmatmul.f32.gmra.mxu3 %v111_v1  ;;  %615 = vmatpush.msra.mxu0 %v946_v29 }
  0x53   :  { %659 = vmatpush.msra.mxu1 %v875_v5  ;;  %718 = vmatpush.msra.mxu2 %v957_v33  ;;  %v477_v5 = vand.u32 4294901760, %v476_v20 }
  0x54   :  { %779 = vmatpush.msra.mxu3 %v886_v9  ;;  %433 = vmatmul.f32.vlgmr.msrb.gmra.mxu1 %v1183_v48 }
  0x55   :  { %618 = vmatpush.msra.mxu0 %v963_v35  ;;  %661 = vmatpush.msra.mxu1 %v886_v9  ;;  %v483_v9 = vand.u32 4294901760, %v482_v4 }
  0x56   :  { %722 = vmatpush.msra.mxu2 %v977_v40  ;;  %781 = vmatpush.msra.mxu3 %v888_v10 }
  0x57   :  { %621 = vmatpush.msra.mxu0 %v995_v46  ;;  %663 = vmatpush.msra.mxu1 %v888_v10  ;;  %v1430_v10 = vld [vmem:[#allocation3_spill] sm:$0xff]  ;;  %v484_v24 = vsub.f32 %v482_v4, %v483_v9 }
  0x58   :  { %726 = vmatpush.msra.mxu2 %v981_v41  ;;  %783 = vmatpush.msra.mxu3 %v890_v11 }
  0x59   :  { %624 = vmatpush.msra.mxu0 %v1429_v23  ;;  %665 = vmatpush.msra.mxu1 %v890_v11  ;;  %v1431_v11 = vld [vmem:[#allocation4_spill] sm:$0xff] }
  0x5a   :  { %730 = vmatpush.msra.mxu2 %v1000_v47  ;;  %785 = vmatpush.msra.mxu3 %v909_v17 }
  0x5b   :  { %396 = vmatmul.f32.gmra.mxu0 %v1221_v49  ;;  %478 = vmatmul.f32.vlgmr.msrb.gmra.mxu2 %v477_v5 }
  0x5c   :  { %587 = vmatmul.f32.vlgmr.msrb.gmra.mxu3 %v1272_v53  ;;  %627 = vmatpush.msra.mxu0 %v1430_v10 }
  0x5d   :  { %667 = vmatpush.msra.mxu1 %v909_v17  ;;  %734 = vmatpush.msra.mxu2 %v1030_v57  ;;  %v485_v17 = vand.u32 4294901760, %v484_v24 }
  0x5e   :  { %787 = vmatpush.msra.mxu3 %v920_v21  ;;  %437 = vmatmul.f32.gmra.mxu1 %v1221_v49 }
  0x5f   :  { %630 = vmatpush.msra.mxu0 %v1431_v11  ;;  %669 = vmatpush.msra.mxu1 %v920_v21  ;;  %v1434_v21 = vld [vmem:[#allocation7_spill] sm:$0xff] }
  0x60   :  { %738 = vmatpush.msra.mxu2 %v1049_v63  ;;  %789 = vmatpush.msra.mxu3 %v943_v28 }
  0x61   :  { %633 = vmatpush.msra.mxu0 %v1432_v25  ;;  %671 = vmatpush.msra.mxu1 %v943_v28  ;;  %v841_v28 = vmov 0.0  }
  0x62   :  { %742 = vmatpush.msra.mxu2 %v1068_v8  ;;  %791 = vmatpush.msra.mxu3 %v960_v34  ;;  %37 = vst.msk [vmem:[%s1415_s2] sm:$0xff] %vm36_vm0, %v841_v28 }
  0x63   :  { %636 = vmatpush.msra.mxu0 %v1433_v27  ;;  %673 = vmatpush.msra.mxu1 %v960_v34  ;;  %38 = vst.msk [vmem:[%s1415_s2 + $0x8] sm:$0xff] %vm36_vm0, %v841_v28 }
  0x64   :  { %746 = vmatpush.msra.mxu2 %v1084_v30  ;;  %793 = vmatpush.msra.mxu3 %v992_v45  ;;  %39 = vst.msk [vmem:[%s1416_s3] sm:$0xff] %vm36_vm0, %v841_v28 }
  0x65   :  { %486 = vmatmul.f32.gmra.mxu2 %v485_v17  ;;  %591 = vmatmul.f32.gmra.mxu3 %v1302_v3  ;;  %40 = vst.msk [vmem:[%s1416_s3 + $0x8] sm:$0xff] %vm36_vm0, %v841_v28 }
  0x66   :  { %639 = vmatpush.msra.mxu0 %v1101_v42  ;;  %675 = vmatpush.msra.mxu1 %v992_v45 }
  0x67   :  { %750 = vmatpush.msra.mxu2 %v1098_v39  ;;  %795 = vmatpush.msra.mxu3 %v1011_v51 }
  0x68   :  { %642 = vmatpush.msra.mxu0 %v1434_v21  ;;  %677 = vmatpush.msra.mxu1 %v1011_v51 }
  0x69   :  { %754 = vmatpush.msra.mxu2 %v1112_v50  ;;  %797 = vmatpush.msra.mxu3 %v1027_v56 }
  0x6a   :  { %645 = vmatmul.f32.vlgmr.msra.gmra.mxu0 %v1287_v16  ;;  %679 = vmatpush.msra.mxu1 %v1027_v56 }
  0x6b   :  { %758 = vmatpush.msra.mxu2 %v1126_v60  ;;  %799 = vmatpush.msra.mxu3 %v1046_v62  ;;  %v814_v60 = vld [vmem:[%s1415_s2 + $0x8] sm:$0xff]  ;;  %v820_v32 = vld [vmem:[%s1416_s3] sm:$0xff] }
  0x6c   :  { %681 = vmatpush.msra.mxu1 %v1046_v62  ;;  %v813_v62 = vld [vmem:[%s1415_s2] sm:$0xff] }
  0x6d   :  { %762 = vmatpush.msra.mxu2 %v1137_v18  ;;  %801 = vmatpush.msra.mxu3 %v1065_v7 }
  0x6e   :  { %764 = vmatmul.f32.vlgmr.msra.gmra.mxu2 %v1272_v53  ;;  %683 = vmatpush.msra.mxu1 %v1065_v7 }
  0x6f   :  { %803 = vmatpush.msra.mxu3 %v1081_v26 }
  0x70   :  { %805 = vmatmul.f32.vlgmr.msra.gmra.mxu3 %v1272_v53  ;;  %685 = vmatpush.msra.mxu1 %v1081_v26 }
  0x71   :  { %689 = vmatmul.f32.vlgmr.msra.gmra.mxu1 %v475_v19  ;;  %v821_v19 = vld [vmem:[%s1416_s3 + $0x8] sm:$0xff] }
  0x72   :  { %650 = vmatmul.f32.gmra.mxu0 %v482_v4 }
  0x76   :  { %768 = vmatmul.f32.gmra.mxu2 %v1302_v3 }
  0x78   :  { %809 = vmatmul.f32.gmra.mxu3 %v1302_v3 }
  0x79   :  { %695 = vmatmul.f32.gmra.mxu1 %v483_v9 }
  0xb6   :  { %v107_v29 = vpop.f32.mrf.mxu0 }
  0xba   :  { %v216_v33 = vpop.f32.mrf.mxu1 }
  0xbb   :  { %v217_v34 = vadd.f32 %v216_v33, %v107_v29 }
  0xc2   :  { %v115_v35 = vpop.f32.mrf.mxu0 }
  0xc6   :  { %v274_v40 = vpop.f32.mrf.mxu2  ;;  %v220_v41 = vpop.f32.mrf.mxu1 }
  0xc7   :  { %v275_v45 = vadd.f32 %v274_v40, %v217_v34  ;;  %v221_v56 = vadd.f32 %v220_v41, %v115_v35 }
  0xc9   :  { %v318_v46 = vpop.f32.mrf.mxu3 }
  0xca   :  { %v319_v47 = vadd.f32 %v318_v46, %v275_v45 }
  0xce   :  { %v393_v51 = vpop.f32.mrf.mxu0 }
  0xcf   :  { %v394_v57 = vadd.f32 %v393_v51, %v319_v47 }
  0xd1   :  { %v434_v58 = vpop.f32.mrf.mxu1 }
  0xd2   :  { %v435_v63 = vadd.f32 %v434_v58, %v394_v57  ;;  %v279_v7 = vpop.f32.mrf.mxu2 }
  0xd3   :  { %v280_v8 = vadd.f32 %v279_v7, %v221_v56 }
  0xd4   :  { %v815_v26 = vadd.f32 %v813_v62, %v435_v63 }
  0xd5   :  { %v324_v30 = vpop.f32.mrf.mxu3 }
  0xd6   :  { %818 = vst.msk [vmem:[%s1415_s2] sm:$0xff] %vm36_vm0, %v815_v26  ;;  %v325_v39 = vadd.f32 %v324_v30, %v280_v8 }
  0xd8   :  { %v397_v42 = vpop.f32.mrf.mxu0 }
  0xd9   :  { %v398_v50 = vadd.f32 %v397_v42, %v325_v39 }
  0xdb   :  { %v438_v54 = vpop.f32.mrf.mxu1 }
  0xdc   :  { %v439_v2 = vadd.f32 %v438_v54, %v398_v50 }
  0xde   :  { %v816_v18 = vadd.f32 %v814_v60, %v439_v2  ;;  %v479_v36 = vpop.f32.mrf.mxu2 }
  0xdf   :  { %v588_v59 = vpop.f32.mrf.mxu3 }
  0xe0   :  { %819 = vst.msk [vmem:[%s1415_s2 + $0x8] sm:$0xff] %vm36_vm0, %v816_v18  ;;  %v589_v37 = vadd.f32 %v588_v59, %v479_v36 }
  0xe7   :  { %v646_v6 = vpop.f32.mrf.mxu0 }
  0xe8   :  { %v487_v48 = vpop.f32.mrf.mxu2  ;;  %v592_v31 = vpop.f32.mrf.mxu3  ;;  %v647_v38 = vadd.f32 %v646_v6, %v589_v37 }
  0xe9   :  { %v593_v1 = vadd.f32 %v592_v31, %v487_v48 }
  0xee   :  { %v690_v43 = vpop.f32.mrf.mxu1 }
  0xef   :  { %v691_v49 = vadd.f32 %v690_v43, %v647_v38  ;;  %v651_v55 = vpop.f32.mrf.mxu0 }
  0xf0   :  { %v652_v0 = vadd.f32 %v651_v55, %v593_v1 }
  0xf1   :  { %v765_v52 = vpop.f32.mrf.mxu2 }
  0xf2   :  { %v766_v61 = vadd.f32 %v765_v52, %v691_v49 }
  0xf3   :  { %v806_v13 = vpop.f32.mrf.mxu3 }
  0xf4   :  { %v807_v44 = vadd.f32 %v806_v13, %v766_v61 }
  0xf6   :  { %v822_v12 = vadd.f32 %v820_v32, %v807_v44  ;;  %v696_v53 = vpop.f32.mrf.mxu1 }
  0xf7   :  { %v697_v14 = vadd.f32 %v696_v53, %v652_v0 }
  0xf8   :  { %824 = vst.msk [vmem:[%s1416_s3] sm:$0xff] %vm36_vm0, %v822_v12 }
  0xf9   :  { %v769_v15 = vpop.f32.mrf.mxu2 }
  0xfa   :  { %v770_v16 = vadd.f32 %v769_v15, %v697_v14 }
  0xfb   :  { %v810_v22 = vpop.f32.mrf.mxu3 }
  0xfc   :  { %v811_v3 = vadd.f32 %v810_v22, %v770_v16 }
  0xfe   :  { %v823_v20 = vadd.f32 %v821_v19, %v811_v3 }
 0x100   :  { %825 = vst.msk [vmem:[%s1416_s3 + $0x8] sm:$0xff] %vm36_vm0, %v823_v20 }

</bundles_post_ra>
